<compile_context>
chip_gen: v7x
topology: tpu7x:2x2x1
jax: 0.10.0
libtpu: 0.0.40
codegen_flags: <defaults>
</compile_context>

<pallas_src>
import functools

import jax
import jax.numpy as jnp
from jax.experimental import pallas as pl
from jax.experimental.pallas import tpu as pltpu

SAMPLING_MEAN = 1.0
WEIGHT = 10000.0

LANES = 128
SUBLANES = 8                  # f32 sublane tile
ROW_ALIGN = 32                # row-tile alignment valid for f32/bf16/8-bit packing
MAX_TILE_BYTES = 4 << 20      # per-input block: 4 MiB (8192 rows f32)
VMEM_LIMIT_BYTES = 48 << 20   # above v5e's 16 MiB scoped default, < v7x 64 MiB physical


def _cdiv(a, b):
    return -(-a // b)


def _round_up(a, b):
    return _cdiv(a, b) * b


def _default_num_shards():
    """2 grid-shards only on multi-TensorCore chips; 1 elsewhere."""
    try:
        kind = jax.devices()[0].device_kind.lower()
    except Exception:
        return 2
    if "lite" in kind or "v5e" in kind or "v6e" in kind:
        return 1  # single TensorCore: a shard axis would just be a serial loop
    return 2      # v4/v5p megacore, v7x (2 TCs); harmless (serial) elsewhere


def _l1rel_partial_kernel(o_ref, t_ref, abs_acc_ref, rel_acc_ref, *,
                          sampling_mean, blocks_per_shard, total_blocks,
                          full_rows, rem_lanes, needs_mask):
    """Accumulate per-shard (8,128) partial sums of |diff| and diff/(t+mean)."""
    c = pl.program_id(0)   # shard axis ("parallel")
    i = pl.program_id(1)   # reduction step within the shard ("arbitrary")

    @pl.when(i == 0)
    def _():
        abs_acc_ref[...] = jnp.zeros_like(abs_acc_ref)
        rel_acc_ref[...] = jnp.zeros_like(rel_acc_ref)

    tr = o_ref.shape[0]
    k = tr // SUBLANES

    # Native-dtype tiles were DMA'd; cast to f32 in-register (no HBM upcast copy).
    o = o_ref[...].astype(jnp.float32)
    t = t_ref[...].astype(jnp.float32)

    def accumulate(valid):
        if valid is None:
            diff = o - t
            denom = t + jnp.float32(sampling_mean)
        else:
            # Mask BEFORE the arithmetic: out-of-bounds rows of the VMEM block
            # hold unspecified bits (possibly inf/nan); select keeps them out.
            diff = jnp.where(valid, o - t, jnp.float32(0.0))
            denom = jnp.where(valid, t + jnp.float32(sampling_mean), jnp.float32(1.0))
        # Exact reciprocal on the EUP slot (weight=1e4 amplifies approx error).
        inv = pl.reciprocal(denom, approx=False)
        # Sublane-aligned reshape + axis-0 sum: pure cross-vreg VPU adds.
        abs_part = jnp.abs(diff).reshape(k, SUBLANES, LANES).sum(axis=0)
        rel_part = (diff * inv).reshape(k, SUBLANES, LANES).sum(axis=0)
        abs_acc_ref[0, :, :] += abs_part
        rel_acc_ref[0, :, :] += rel_part

    if not needs_mask:
        accumulate(None)
    else:
        gb = c * blocks_per_shard + i   # unclamped global block index

        @pl.when(gb < total_blocks - 1)
        def _():
            accumulate(None)            # interior block: fully valid, mask-free

        @pl.when(gb >= total_blocks - 1)
        def _():
            # Ragged last block, or a duplicated grid step past the end (its
            # index_map is clamped to the last block; the mask below zeros it).
            row = gb * tr + jax.lax.broadcasted_iota(jnp.int32, (tr, LANES), 0)
            lane = jax.lax.broadcasted_iota(jnp.int32, (tr, LANES), 1)
            valid = jnp.logical_or(
                row < full_rows,
                jnp.logical_and(row == full_rows, lane < rem_lanes))
            accumulate(valid)


def l1_relative_loss(output, target, sampling_mean=SAMPLING_MEAN, weight=WEIGHT,
                     max_tile_bytes=MAX_TILE_BYTES, num_shards=None):
    assert output.shape == target.shape
    if num_shards is None:
        num_shards = _default_num_shards()

    n_elem = int(output.size)
    full_rows, rem_lanes = divmod(n_elem, LANES)

    # Flatten in native dtype (free for contiguous arrays) — no astype copy.
    o_flat = output.reshape(-1)
    t_flat = target.reshape(-1)

    if rem_lanes == 0:
        rows = full_rows                      # fully copy-free lane-dense view
        o2d = o_flat.reshape(rows, LANES)
        t2d = t_flat.reshape(rows, LANES)
    else:
        # TODO(synk): element counts not divisible by 128 still pay one minimal
        # (<128-element) jnp.pad copy; the padded tail is masked in-kernel.
        rows = full_rows + 1
        pad = rows * LANES - n_elem
        o2d = jnp.pad(o_flat, (0, pad)).reshape(rows, LANES)
        t2d = jnp.pad(t_flat, (0, pad)).reshape(rows, LANES)

    itemsize = jnp.dtype(o2d.dtype).itemsize
    max_tr = max(ROW_ALIGN,
                 (int(max_tile_bytes) // (LANES * itemsize)) // ROW_ALIGN * ROW_ALIGN)
    tr = min(max_tr, _round_up(_cdiv(rows, num_shards), ROW_ALIGN))
    tr = max(ROW_ALIGN, tr)

    total_blocks = _cdiv(rows, tr)
    blocks_per_shard = _cdiv(total_blocks, num_shards)
    needs_mask = (rem_lanes != 0) or (rows % tr != 0) \
        or (total_blocks != num_shards * blocks_per_shard)

    def in_index(c, i):
        gb = c * blocks_per_shard + i
        # Clamp duplicated end-of-grid steps onto the last block; their
        # contribution is zeroed by the in-kernel mask.
        return (jnp.minimum(gb, total_blocks - 1), 0)

    in_spec = pl.BlockSpec((tr, LANES), in_index)
    # Per-shard resident VMEM accumulators (same block across the 'arbitrary'
    # reduction axis; distinct blocks per 'parallel' shard => no races).
    acc_spec = pl.BlockSpec((1, SUBLANES, LANES), lambda c, i: (c, 0, 0))

    kernel = functools.partial(
        _l1rel_partial_kernel,
        sampling_mean=float(sampling_mean),
        blocks_per_shard=blocks_per_shard,
        total_blocks=total_blocks,
        full_rows=full_rows,
        rem_lanes=rem_lanes,
        needs_mask=needs_mask)

    abs_parts, rel_parts = pl.pallas_call(
        kernel,
        out_shape=(
            jax.ShapeDtypeStruct((num_shards, SUBLANES, LANES), jnp.float32),
            jax.ShapeDtypeStruct((num_shards, SUBLANES, LANES), jnp.float32),
        ),
        grid_spec=pltpu.PrefetchScalarGridSpec(
            num_scalar_prefetch=0,
            grid=(num_shards, blocks_per_shard),
            in_specs=[in_spec, in_spec],
            out_specs=(acc_spec, acc_spec),
        ),
        compiler_params=pltpu.CompilerParams(
            dimension_semantics=("parallel", "arbitrary"),
            vmem_limit_bytes=VMEM_LIMIT_BYTES),
    )(o2d, t2d)

    # Final cheap cross-lane reduction + scalar math happens exactly once.
    n = jnp.float32(n_elem)
    l1 = jnp.sum(abs_parts) / n
    relative_loss = jnp.abs(jnp.sum(rel_parts) / n)
    # Note: like the PyTorch module, target == -sampling_mean yields inf/nan.
    return l1 + jnp.float32(weight) * relative_loss


def l1_relative_loss_ref(output, target, sampling_mean=SAMPLING_MEAN, weight=WEIGHT):
    o = output.astype(jnp.float32)
    t = target.astype(jnp.float32)
    l1 = jnp.mean(jnp.abs(o - t))
    rel = jnp.abs(jnp.mean((o - t) / (t + sampling_mean)))
    return l1 + weight * rel


if __name__ == "__main__":
    key = jax.random.PRNGKey(0)
    k1, k2, k3, k4, k5, k6 = jax.random.split(key, 6)

    loss_fn = jax.jit(l1_relative_loss)

    # Case 1: f32 NCHW, numel multiple of 128 -> fully copy-free path
    # (block is larger than the array -> exercises partial-block masking).
    shape1 = (2, 4, 16, 16)  # 2048 elements
    out1 = jax.random.normal(k1, shape1, dtype=jnp.float32)
    tgt1 = jax.random.normal(k2, shape1, dtype=jnp.float32) + 2.0  # keep t+1 away from 0
    loss1 = jax.block_until_ready(loss_fn(out1, tgt1))
    ref1 = l1_relative_loss_ref(out1, tgt1)
    assert jnp.allclose(loss1, ref1, rtol=1e-4, atol=1e-2), (loss1, ref1)

    # Case 2: awkward numel (not a multiple of 128) -> minimal pad + element mask.
    shape2 = (3, 5, 17, 19)  # 4845 elements
    out2 = jax.random.normal(k3, shape2, dtype=jnp.float32)
    tgt2 = jax.random.normal(k4, shape2, dtype=jnp.float32) + 2.0
    loss2 = jax.block_until_ready(loss_fn(out2, tgt2))
    ref2 = l1_relative_loss_ref(out2, tgt2)
    assert jnp.allclose(loss2, ref2, rtol=1e-4, atol=1e-2), (loss2, ref2)

    # Case 3: bf16 inputs streamed natively and cast to f32 in-register.
    shape3 = (4, 4, 32, 32)  # 16384 elements
    out3 = jax.random.normal(k5, shape3, dtype=jnp.float32).astype(jnp.bfloat16)
    tgt3 = (jnp.abs(jax.random.normal(k6, shape3, dtype=jnp.float32)) + 0.5
            ).astype(jnp.bfloat16)  # t + 1 >= 1.5, safely away from 0
    loss3 = jax.block_until_ready(loss_fn(out3, tgt3))
    ref3 = l1_relative_loss_ref(out3, tgt3)
    assert jnp.allclose(loss3, ref3, rtol=1e-3, atol=5e-2), (loss3, ref3)

    print("KERNEL_OK")
</pallas_src>

<mosaic_0001>
module attributes {stable_mosaic.version = 11 : i64} {
  func.func @_l1rel_partial_kernel(%arg0: i32, %arg1: i32, %arg2: memref<32x128xf32, #tpu.memory_space<vmem>>, %arg3: memref<32x128xf32, #tpu.memory_space<vmem>>, %arg4: memref<1x8x128xf32, #tpu.memory_space<vmem>>, %arg5: memref<1x8x128xf32, #tpu.memory_space<vmem>>) attributes {dimension_semantics = [#tpu.dimension_semantics<parallel>, #tpu.dimension_semantics<arbitrary>], iteration_bounds = array<i64: 2, 1>, scalar_prefetch = 0 : i64, scratch_operands = 0 : i64, tpu.core_type = #tpu.core_type<tc>, window_params = [{transform_indices = @transform_0, window_bounds = array<i64: 32, 128>}, {transform_indices = @transform_1, window_bounds = array<i64: 32, 128>}, {transform_indices = @transform_2, window_bounds = array<i64: 1, 8, 128>}, {transform_indices = @transform_3, window_bounds = array<i64: 1, 8, 128>}]} {
    %c0_i32 = arith.constant 0 : i32
    %0 = arith.cmpi eq, %arg1, %c0_i32 : i32
    %1 = arith.extui %0 : i1 to i32
    %c0_i32_0 = arith.constant 0 : i32
    %2 = arith.cmpi ne, %1, %c0_i32_0 : i32
    scf.if %2 {
      %cst = arith.constant 0.000000e+00 : f32
      %13 = vector.broadcast %cst : f32 to vector<1x8x128xf32>
      %c0_8 = arith.constant 0 : index
      %c0_9 = arith.constant 0 : index
      %c0_10 = arith.constant 0 : index
      %14 = vector.load %arg4[%c0_8, %c0_9, %c0_10] : memref<1x8x128xf32, #tpu.memory_space<vmem>>, vector<1x8x128xf32>
      tpu.vector_store %arg4[%c0_8, %c0_9, %c0_10], %13 {strides = array<i32>} : memref<1x8x128xf32, #tpu.memory_space<vmem>>, vector<1x8x128xf32>,
      %cst_11 = arith.constant 0.000000e+00 : f32
      %15 = vector.broadcast %cst_11 : f32 to vector<1x8x128xf32>
      %c0_12 = arith.constant 0 : index
      %c0_13 = arith.constant 0 : index
      %c0_14 = arith.constant 0 : index
      %16 = vector.load %arg5[%c0_12, %c0_13, %c0_14] : memref<1x8x128xf32, #tpu.memory_space<vmem>>, vector<1x8x128xf32>
      tpu.vector_store %arg5[%c0_12, %c0_13, %c0_14], %15 {strides = array<i32>} : memref<1x8x128xf32, #tpu.memory_space<vmem>>, vector<1x8x128xf32>,
    } else {
    }
    %c0 = arith.constant 0 : index
    %c0_1 = arith.constant 0 : index
    %3 = vector.load %arg2[%c0, %c0_1] : memref<32x128xf32, #tpu.memory_space<vmem>>, vector<32x128xf32>
    %c0_2 = arith.constant 0 : index
    %c0_3 = arith.constant 0 : index
    %4 = vector.load %arg3[%c0_2, %c0_3] : memref<32x128xf32, #tpu.memory_space<vmem>>, vector<32x128xf32>
    %c1_i32 = arith.constant 1 : i32
    %5 = arith.muli %arg0, %c1_i32 : i32
    %6 = arith.addi %5, %arg1 : i32
    %c0_i32_4 = arith.constant 0 : i32
    %7 = arith.cmpi slt, %6, %c0_i32_4 : i32
    %8 = arith.extui %7 : i1 to i32
    %c0_i32_5 = arith.constant 0 : i32
    %9 = arith.cmpi ne, %8, %c0_i32_5 : i32
    scf.if %9 {
      %13 = arith.subf %3, %4 : vector<32x128xf32>
      %cst = arith.constant 1.000000e+00 : f32
      %14 = vector.broadcast %cst : f32 to vector<32x128xf32>
      %15 = arith.addf %4, %14 : vector<32x128xf32>
      %16 = tpu.reciprocal %15 : vector<32x128xf32> -> vector<32x128xf32>
      %17 = math.absf %13 : vector<32x128xf32>
      %18 = vector.shape_cast %17 : vector<32x128xf32> to vector<4x8x128xf32>
      %cst_8 = arith.constant dense<0.000000e+00> : vector<8x128xf32>
      %19 = vector.multi_reduction <add>, %18, %cst_8 [0] : vector<4x8x128xf32> to vector<8x128xf32>
      %20 = arith.mulf %13, %16 : vector<32x128xf32>
      %21 = vector.shape_cast %20 : vector<32x128xf32> to vector<4x8x128xf32>
      %cst_9 = arith.constant dense<0.000000e+00> : vector<8x128xf32>
      %22 = vector.multi_reduction <add>, %21, %cst_9 [0] : vector<4x8x128xf32> to vector<8x128xf32>
      %c0_10 = arith.constant 0 : index
      %c0_11 = arith.constant 0 : index
      %c0_12 = arith.constant 0 : index
      %23 = vector.load %arg4[%c0_10, %c0_11, %c0_12] : memref<1x8x128xf32, #tpu.memory_space<vmem>>, vector<1x8x128xf32>
      %24 = vector.shape_cast %23 : vector<1x8x128xf32> to vector<8x128xf32>
      %25 = arith.addf %24, %19 : vector<8x128xf32>
      %c0_13 = arith.constant 0 : index
      %c0_14 = arith.constant 0 : index
      %c0_15 = arith.constant 0 : index
      %26 = vector.load %arg4[%c0_13, %c0_14, %c0_15] : memref<1x8x128xf32, #tpu.memory_space<vmem>>, vector<1x8x128xf32>
      %27 = vector.shape_cast %26 : vector<1x8x128xf32> to vector<8x128xf32>
      %28 = vector.shape_cast %25 : vector<8x128xf32> to vector<1x8x128xf32>
      tpu.vector_store %arg4[%c0_13, %c0_14, %c0_15], %28 {strides = array<i32>} : memref<1x8x128xf32, #tpu.memory_space<vmem>>, vector<1x8x128xf32>,
      %c0_16 = arith.constant 0 : index
      %c0_17 = arith.constant 0 : index
      %c0_18 = arith.constant 0 : index
      %29 = vector.load %arg5[%c0_16, %c0_17, %c0_18] : memref<1x8x128xf32, #tpu.memory_space<vmem>>, vector<1x8x128xf32>
      %30 = vector.shape_cast %29 : vector<1x8x128xf32> to vector<8x128xf32>
      %31 = arith.addf %30, %22 : vector<8x128xf32>
      %c0_19 = arith.constant 0 : index
      %c0_20 = arith.constant 0 : index
      %c0_21 = arith.constant 0 : index
      %32 = vector.load %arg5[%c0_19, %c0_20, %c0_21] : memref<1x8x128xf32, #tpu.memory_space<vmem>>, vector<1x8x128xf32>
      %33 = vector.shape_cast %32 : vector<1x8x128xf32> to vector<8x128xf32>
      %34 = vector.shape_cast %31 : vector<8x128xf32> to vector<1x8x128xf32>
      tpu.vector_store %arg5[%c0_19, %c0_20, %c0_21], %34 {strides = array<i32>} : memref<1x8x128xf32, #tpu.memory_space<vmem>>, vector<1x8x128xf32>,
    } else {
    }
    %c0_i32_6 = arith.constant 0 : i32
    %10 = arith.cmpi sge, %6, %c0_i32_6 : i32
    %11 = arith.extui %10 : i1 to i32
    %c0_i32_7 = arith.constant 0 : i32
    %12 = arith.cmpi ne, %11, %c0_i32_7 : i32
    scf.if %12 {
      %c32_i32 = arith.constant 32 : i32
      %13 = arith.muli %6, %c32_i32 : i32
      %14 = tpu.iota {dimensions = array<i32: 0>} : vector<32x128xi32>
      %15 = vector.broadcast %13 : i32 to vector<32x128xi32>
      %16 = arith.addi %15, %14 : vector<32x128xi32>
      %17 = tpu.iota {dimensions = array<i32: 1>} : vector<32x128xi32>
      %c16_i32 = arith.constant 16 : i32
      %18 = vector.broadcast %c16_i32 : i32 to vector<32x128xi32>
      %19 = arith.cmpi slt, %16, %18 : vector<32x128xi32>
      %c16_i32_8 = arith.constant 16 : i32
      %20 = vector.broadcast %c16_i32_8 : i32 to vector<32x128xi32>
      %21 = arith.cmpi eq, %16, %20 : vector<32x128xi32>
      %c0_i32_9 = arith.constant 0 : i32
      %22 = vector.broadcast %c0_i32_9 : i32 to vector<32x128xi32>
      %23 = arith.cmpi slt, %17, %22 : vector<32x128xi32>
      %24 = arith.andi %21, %23 : vector<32x128xi1>
      %25 = arith.ori %19, %24 : vector<32x128xi1>
      %26 = arith.subf %3, %4 : vector<32x128xf32>
      %cst = arith.constant 0.000000e+00 : f32
      %27 = vector.broadcast %cst : f32 to vector<32x128xf32>
      %28 = arith.select %25, %26, %27 : vector<32x128xi1>, vector<32x128xf32>
      %cst_10 = arith.constant 1.000000e+00 : f32
      %29 = vector.broadcast %cst_10 : f32 to vector<32x128xf32>
      %30 = arith.addf %4, %29 : vector<32x128xf32>
      %cst_11 = arith.constant 1.000000e+00 : f32
      %31 = vector.broadcast %cst_11 : f32 to vector<32x128xf32>
      %32 = arith.select %25, %30, %31 : vector<32x128xi1>, vector<32x128xf32>
      %33 = tpu.reciprocal %32 : vector<32x128xf32> -> vector<32x128xf32>
      %34 = math.absf %28 : vector<32x128xf32>
      %35 = vector.shape_cast %34 : vector<32x128xf32> to vector<4x8x128xf32>
      %cst_12 = arith.constant dense<0.000000e+00> : vector<8x128xf32>
      %36 = vector.multi_reduction <add>, %35, %cst_12 [0] : vector<4x8x128xf32> to vector<8x128xf32>
      %37 = arith.mulf %28, %33 : vector<32x128xf32>
      %38 = vector.shape_cast %37 : vector<32x128xf32> to vector<4x8x128xf32>
      %cst_13 = arith.constant dense<0.000000e+00> : vector<8x128xf32>
      %39 = vector.multi_reduction <add>, %38, %cst_13 [0] : vector<4x8x128xf32> to vector<8x128xf32>
      %c0_14 = arith.constant 0 : index
      %c0_15 = arith.constant 0 : index
      %c0_16 = arith.constant 0 : index
      %40 = vector.load %arg4[%c0_14, %c0_15, %c0_16] : memref<1x8x128xf32, #tpu.memory_space<vmem>>, vector<1x8x128xf32>
      %41 = vector.shape_cast %40 : vector<1x8x128xf32> to vector<8x128xf32>
      %42 = arith.addf %41, %36 : vector<8x128xf32>
      %c0_17 = arith.constant 0 : index
      %c0_18 = arith.constant 0 : index
      %c0_19 = arith.constant 0 : index
      %43 = vector.load %arg4[%c0_17, %c0_18, %c0_19] : memref<1x8x128xf32, #tpu.memory_space<vmem>>, vector<1x8x128xf32>
      %44 = vector.shape_cast %43 : vector<1x8x128xf32> to vector<8x128xf32>
      %45 = vector.shape_cast %42 : vector<8x128xf32> to vector<1x8x128xf32>
      tpu.vector_store %arg4[%c0_17, %c0_18, %c0_19], %45 {strides = array<i32>} : memref<1x8x128xf32, #tpu.memory_space<vmem>>, vector<1x8x128xf32>,
      %c0_20 = arith.constant 0 : index
      %c0_21 = arith.constant 0 : index
      %c0_22 = arith.constant 0 : index
      %46 = vector.load %arg5[%c0_20, %c0_21, %c0_22] : memref<1x8x128xf32, #tpu.memory_space<vmem>>, vector<1x8x128xf32>
      %47 = vector.shape_cast %46 : vector<1x8x128xf32> to vector<8x128xf32>
      %48 = arith.addf %47, %39 : vector<8x128xf32>
      %c0_23 = arith.constant 0 : index
      %c0_24 = arith.constant 0 : index
      %c0_25 = arith.constant 0 : index
      %49 = vector.load %arg5[%c0_23, %c0_24, %c0_25] : memref<1x8x128xf32, #tpu.memory_space<vmem>>, vector<1x8x128xf32>
      %50 = vector.shape_cast %49 : vector<1x8x128xf32> to vector<8x128xf32>
      %51 = vector.shape_cast %48 : vector<8x128xf32> to vector<1x8x128xf32>
      tpu.vector_store %arg5[%c0_23, %c0_24, %c0_25], %51 {strides = array<i32>} : memref<1x8x128xf32, #tpu.memory_space<vmem>>, vector<1x8x128xf32>,
    } else {
    }
    return
  }
  func.func @transform_0(%arg0: i32, %arg1: i32) -> (i32, i32) {
    %c1_i32 = arith.constant 1 : i32
    %0 = arith.muli %arg0, %c1_i32 : i32
    %1 = arith.addi %0, %arg1 : i32
    %c0_i32 = arith.constant 0 : i32
    %2 = arith.minsi %1, %c0_i32 : i32
    %c0_i32_0 = arith.constant 0 : i32
    %c0_i32_1 = arith.constant 0 : i32
    return %2, %c0_i32_0 : i32, i32
  }
  func.func @transform_1(%arg0: i32, %arg1: i32) -> (i32, i32) {
    %c1_i32 = arith.constant 1 : i32
    %0 = arith.muli %arg0, %c1_i32 : i32
    %1 = arith.addi %0, %arg1 : i32
    %c0_i32 = arith.constant 0 : i32
    %2 = arith.minsi %1, %c0_i32 : i32
    %c0_i32_0 = arith.constant 0 : i32
    %c0_i32_1 = arith.constant 0 : i32
    return %2, %c0_i32_0 : i32, i32
  }
  func.func @transform_2(%arg0: i32, %arg1: i32) -> (i32, i32, i32) {
    %c0_i32 = arith.constant 0 : i32
    %c0_i32_0 = arith.constant 0 : i32
    %c0_i32_1 = arith.constant 0 : i32
    return %arg0, %c0_i32, %c0_i32_0 : i32, i32, i32
  }
  func.func @transform_3(%arg0: i32, %arg1: i32) -> (i32, i32, i32) {
    %c0_i32 = arith.constant 0 : i32
    %c0_i32_0 = arith.constant 0 : i32
    %c0_i32_1 = arith.constant 0 : i32
    return %arg0, %c0_i32, %c0_i32_0 : i32, i32, i32
  }
}

</mosaic_0001>

<bundles_post_ra>
// kernel: l1_relative_loss.1
= control target key start
LH: loop header
LB: loop body
LE: loop exit
PB: predicated region body
PF: predicated region fallthrough
CT: control target
= control target key end

     0   :  { %s609_s12 = smov 0   ;;  %s611_s13 = smov 0   ;;  %s714_s0 = inlined_call_operand.vmem [shape: f32[16,128], index: 0, kind: input, shape index: {}]   ;;  %s715_s1 = inlined_call_operand.vmem [shape: f32[16,128], index: 1, kind: input, shape index: {}]   ;;  %s716_s2 = inlined_call_operand.vmem [shape: f32[2,8,128], index: 2, kind: output, shape index: {0}]   ;;  %s717_s3 = inlined_call_operand.vmem [shape: f32[2,8,128], index: 3, kind: output, shape index: {1}]  }
   0x1   :  { %s613_s14 = smov 0  }
   0x2 LB: > { %s26_s15 = sadd.s32 1, %s582_s13  ;;  %p511_p0 = scmp.ge.s32.totalorder %s586_s14, 1  ;;  %s586_s14 = sphi %s613_s14, %s14_s14   ;;  %s582_s13 = sphi %s611_s13, %s719_s13   ;;  %s578_s12 = sphi %s609_s12, %s718_s12  }
   0x3   : > { %p28_p1 = scmp.ge.s32.totalorder %s26_s15, 2  ;;  %p196_p2 = scmp.lt.s32.totalorder %s586_s14, 3 }
   0x5   : > { %s721_s15 = smov (%p28_p1, %s26_s15), 0  ;;  %p197_p3 = pnand %p511_p0, %p196_p2 }
   0x6   : > { %p239_p4 = scmp.lt.s32.totalorder (!%p197_p3), %s578_s12, 0  ;;  %p270_p5 = scmp.lt.s32.totalorder (!%p197_p3), %s578_s12, 1  ;;  %v588_v0 = vmov (!%p197_p3), 0.0  }
   0x7   : > { %200 = sbr.rel (%p197_p3) target bundleno = 81 (0x51), region = 28  ;;  %p518_p7 = scmp.ge.s32.totalorder (!%p197_p3), %s578_s12, 0 }
   0xe   : > { %s240_s16 = scalar_select %p239_p4, %s578_s12, 0 }
   0xf   : > { %s271_s17 = scalar_select %p270_p5, %s578_s12, 1 }
  0x10   : > { %s512_s18 = sshll.u32 %s240_s16, 2 }
  0x11   : > { %p244_p6 = scmp.lt.s32.totalorder %s512_s18, 1  ;;  %s516_s19 = sshll.u32 %s271_s17, 3 }
  0x12   : > { %s638_s22 = scalar_lea.vmem %s716_s2, %s516_s19  ;;  %s643_s25 = scalar_lea.vmem %s717_s3, %s516_s19 }
  0x13   : > { %s723_s18 = smov (!%p244_p6, %s512_s18), 1  ;;  %282 = vst [vmem:[%s638_s22] sm:$0xff] %v588_v0  ;;  %283 = vst [vmem:[%s643_s25] sm:$0xff] %v588_v0  ;;  %296 = sbr.rel (%p518_p7) target bundleno = 49 (0x31), region = 36 }
  0x14   : > { %s513_s26 = sshll.u32 %s723_s18, 3 }
  0x15   : > { %s247_s29 = scalar_lea.vmem %s714_s0, %s513_s26  ;;  %s263_s5 = scalar_lea.vmem %s715_s1, %s513_s26 }
  0x16   : > { %v653_v1 = vld [vmem:[%s247_s29] sm:$0xff]  ;;  %v655_v2 = vld [vmem:[%s247_s29 + $0x8] sm:$0xff]  ;;  %v657_v3 = vld [vmem:[%s247_s29 + $0x10] sm:$0xff] }
  0x17   : > { %v659_v4 = vld [vmem:[%s247_s29 + $0x18] sm:$0xff]  ;;  %v661_v5 = vld [vmem:[%s263_s5] sm:$0xff]  ;;  %v663_v6 = vld [vmem:[%s263_s5 + $0x8] sm:$0xff] }
  0x18   : > { %v665_v7 = vld [vmem:[%s263_s5 + $0x10] sm:$0xff]  ;;  %v667_v8 = vld [vmem:[%s263_s5 + $0x18] sm:$0xff]  ;;  %v297_v9 = vsub.f32 (!%p518_p7), %v653_v1, %v661_v5  ;;  %v298_v10 = vsub.f32 (!%p518_p7), %v655_v2, %v663_v6  ;;  %v301_v13 = vadd.f32 (!%p518_p7), 1.0, %v661_v5  ;;  %v302_v14 = vadd.f32 (!%p518_p7), 1.0, %v663_v6 }
  0x19   : > { %v299_v11 = vsub.f32 (!%p518_p7), %v657_v3, %v665_v7  ;;  %v300_v12 = vsub.f32 (!%p518_p7), %v659_v4, %v667_v8  ;;  %v303_v15 = vadd.f32 (!%p518_p7), 1.0, %v665_v7  ;;  %v304_v16 = vadd.f32 (!%p518_p7), 1.0, %v667_v8 }
  0x1a   : > { %v309_v17 = vand.u32 2147483647, %v297_v9  ;;  %v310_v18 = vand.u32 2147483647, %v298_v10  ;;  %548 = vrcp.f32 %v301_v13  ;;  %v323_v23 = vld [vmem:[%s638_s22] sm:$0xff] }
  0x1b   : > { %v311_v19 = vand.u32 2147483647, %v299_v11  ;;  %v312_v20 = vand.u32 2147483647, %v300_v12  ;;  %550 = vrcp.f32 %v302_v14  ;;  %v326_v36 = vld [vmem:[%s643_s25] sm:$0xff] }
  0x1c   : > { %v313_v21 = vadd.f32 %v310_v18, %v309_v17  ;;  %552 = vrcp.f32 %v303_v15 }
  0x1d   : > { %554 = vrcp.f32 %v304_v16 }
  0x1e   : > { %v314_v22 = vadd.f32 %v313_v21, %v311_v19 }
  0x20   : > { %v315_v24 = vadd.f32 %v314_v22, %v312_v20 }
  0x22   : > { %v324_v25 = vadd.f32 %v323_v23, %v315_v24 }
  0x24   : > { %325 = vst [vmem:[%s638_s22] sm:$0xff] %v324_v25  ;;  %v549_v26 = vpop.eup %548 }
  0x25   : > { %v551_v27 = vpop.eup %550  ;;  %v316_v28 = vmul.f32 %v549_v26, %v297_v9 }
  0x26   : > { %v553_v29 = vpop.eup %552  ;;  %v317_v30 = vmul.f32 %v551_v27, %v298_v10 }
  0x27   : > { %v555_v31 = vpop.eup %554  ;;  %v318_v32 = vmul.f32 %v553_v29, %v299_v11 }
  0x28   : > { %v319_v33 = vmul.f32 %v555_v31, %v300_v12  ;;  %v320_v34 = vadd.f32 %v317_v30, %v316_v28 }
  0x2a   : > { %v321_v35 = vadd.f32 %v320_v34, %v318_v32 }
  0x2c   : > { %v322_v37 = vadd.f32 %v321_v35, %v319_v33 }
  0x2e   : > { %v327_v38 = vadd.f32 %v326_v36, %v322_v37 }
  0x30   : > { %328 = vst [vmem:[%s643_s25] sm:$0xff] %v327_v38 }
  0x31 PF: > { %332 = sbr.rel (%p239_p4) target bundleno = 81 (0x51), region = 40  ;;  %s520_s6 = sshll.u32 (!%p239_p4), %s578_s12, 5  ;;  %v334_v39 = vlaneseq (!%p239_p4)  ;;  %v363_v42 = vsub.f32 (!%p239_p4), %v653_v1, %v661_v5  ;;  %v364_v43 = vsub.f32 (!%p239_p4), %v655_v2, %v663_v6  ;;  %v365_v44 = vsub.f32 (!%p239_p4), %v657_v3, %v665_v7 }
  0x32   : > { %v339_v40 = vstv (!%p239_p4), %s520_s6  ;;  %v371_v45 = vadd.f32 (!%p239_p4), 1.0, %v661_v5  ;;  %v366_v50 = vsub.f32 (!%p239_p4), %v659_v4, %v667_v8  ;;  %v372_v51 = vadd.f32 (!%p239_p4), 1.0, %v663_v6 }
  0x33   : > { %v335_v41 = vshrl.u32 (!%p239_p4), %v334_v39, 7  ;;  %v373_v52 = vadd.f32 (!%p239_p4), 1.0, %v665_v7  ;;  %v374_v53 = vadd.f32 (!%p239_p4), 1.0, %v667_v8  ;;  %v397_v7 = vld [vmem:[%s638_s22] sm:$0xff] (!%p239_p4) }
  0x35   : > { %v336_v46 = vadd.s32 (!%p239_p4), 8, %v335_v41  ;;  %v337_v47 = vadd.s32 (!%p239_p4), 16, %v335_v41  ;;  %v338_v48 = vadd.s32 (!%p239_p4), 24, %v335_v41  ;;  %v340_v49 = vadd.s32 (!%p239_p4), %v339_v40, %v335_v41 }
  0x37   : > { %v341_v54 = vadd.s32 (!%p239_p4), %v339_v40, %v336_v46  ;;  %v342_v55 = vadd.s32 (!%p239_p4), %v339_v40, %v337_v47  ;;  %v343_v56 = vadd.s32 (!%p239_p4), %v339_v40, %v338_v48  ;;  %vm346_vm0 = vcmp.lt.s32.totalorder (!%p239_p4), %v340_v49, 16  ;;  %v400_v20 = vld [vmem:[%s643_s25] sm:$0xff] (!%p239_p4) }
  0x38   : > { %v367_v57 = vsel %vm346_vm0, %v363_v42, 0.0  ;;  %v375_v58 = vsel %vm346_vm0, %v371_v45, 1.0 }
  0x39   : > { %vm347_vm1 = vcmp.lt.s32.totalorder %v341_v54, 16  ;;  %vm348_vm2 = vcmp.lt.s32.totalorder %v342_v55, 16  ;;  %vm349_vm3 = vcmp.lt.s32.totalorder %v343_v56, 16  ;;  %556 = vrcp.f32 %v375_v58 }
  0x3a   : > { %v368_v59 = vsel %vm347_vm1, %v364_v43, 0.0  ;;  %v369_v60 = vsel %vm348_vm2, %v365_v44, 0.0  ;;  %v370_v61 = vsel %vm349_vm3, %v366_v50, 0.0  ;;  %v376_v62 = vsel %vm347_vm1, %v372_v51, 1.0 }
  0x3b   : > { %v377_v63 = vsel %vm348_vm2, %v373_v52, 1.0  ;;  %v378_v0 = vsel %vm349_vm3, %v374_v53, 1.0  ;;  %558 = vrcp.f32 %v376_v62  ;;  %v383_v1 = vand.u32 2147483647, %v367_v57 }
  0x3c   : > { %560 = vrcp.f32 %v377_v63  ;;  %v384_v2 = vand.u32 2147483647, %v368_v59  ;;  %v385_v3 = vand.u32 2147483647, %v369_v60  ;;  %v386_v4 = vand.u32 2147483647, %v370_v61 }
  0x3d   : > { %562 = vrcp.f32 %v378_v0 }
  0x3e   : > { %v387_v5 = vadd.f32 %v384_v2, %v383_v1 }
  0x40   : > { %v388_v6 = vadd.f32 %v387_v5, %v385_v3 }
  0x42   : > { %v389_v8 = vadd.f32 %v388_v6, %v386_v4 }
  0x43   : > { %v557_v9 = vpop.eup %556 }
  0x44   : > { %v398_v10 = vadd.f32 %v397_v7, %v389_v8  ;;  %v390_v11 = vmul.f32 %v557_v9, %v367_v57 }
  0x45   : > { %v559_v12 = vpop.eup %558 }
  0x46   : > { %v561_v13 = vpop.eup %560  ;;  %399 = vst [vmem:[%s638_s22] sm:$0xff] %v398_v10  ;;  %v391_v14 = vmul.f32 %v559_v12, %v368_v59 }
  0x47   : > { %v563_v15 = vpop.eup %562  ;;  %v392_v16 = vmul.f32 %v561_v13, %v369_v60 }
  0x48   : > { %v393_v17 = vmul.f32 %v563_v15, %v370_v61  ;;  %v394_v18 = vadd.f32 %v391_v14, %v390_v11 }
  0x4a   : > { %v395_v19 = vadd.f32 %v394_v18, %v392_v16 }
  0x4c   : > { %v396_v21 = vadd.f32 %v395_v19, %v393_v17 }
  0x4e   : > { %v401_v22 = vadd.f32 %v400_v20, %v396_v21 }
  0x50   : > { %402 = vst [vmem:[%s643_s25] sm:$0xff] %v401_v22 }
  0x51 PF: > { %s14_s14 = sadd.s32 1, %s586_s14   ;;  %s718_s12 = smov %s582_s13 }
  0x52   : > { %p11_p8 = scmp.ge.s32.totalorder %s14_s14, 4   ;;  %s719_s13 = smov %s721_s15 }
  0x54   :  { %13 = sbr.rel (!%p11_p8) target bundleno = 2 (0x2), region = 85 }

</bundles_post_ra>
